<compile_context>
chip_gen: v5e
topology: v5e:2x2
jax: 0.10.0
libtpu: 0.0.40
codegen_flags: <defaults>
</compile_context>

<pallas_src>
import jax
import jax.numpy as jnp
from jax.experimental import pallas as pl
from jax.experimental.pallas import tpu as pltpu


_SQRT_2_OVER_PI = 0.7978845608028654          # sqrt(2/pi), hoisted
_GELU_B = 0.044715 * _SQRT_2_OVER_PI          # 0.044715*sqrt(2/pi), hoisted
_HAS_BUFFERED = hasattr(pl, "Buffered")


def _gelu_new(x):
    # GPT-2 "gelu_new": 0.5*x*(1 + tanh(sqrt(2/pi)*(x + 0.044715*x^3)))
    # tanh argument factored as x*(a + b*x*x): 3 muls + 1 add feeding EUP tanh.
    x2 = x * x
    return 0.5 * x * (1.0 + jnp.tanh(x * (_SQRT_2_OVER_PI + _GELU_B * x2)))


def _round_up(v, m):
    return (v + m - 1) // m * m


def _default_vmem_limit_bytes():
    """Generation-aware scoped-VMEM request."""
    try:
        info = pltpu.get_tpu_info()
        cap = int(getattr(info, "vmem_capacity_bytes", 128 << 20))
    except Exception:
        return 64 << 20                        # unknown chip: conservative
    if cap <= (64 << 20):                      # v7x: 64 MiB/TC -> leave headroom
        return 52 << 20
    return min(100 << 20, int(cap * 0.8))      # v5e/v6e: 128 MiB physical


def prepare_mlp_params(w_fc, b_fc, w_proj, b_proj):
    """Pad feature dims to multiples of 128 and cast weights to bf16 ONCE
    (model-load time) so each forward call doesn't re-pay the pad/cast HBM
    traffic.  Zero padding is exact (see notes in mlp_forward)."""
    nx, n_state = w_fc.shape
    nx_p = _round_up(nx, 128)
    ns_p = _round_up(n_state, 128)
    return {
        "nx": nx, "n_state": n_state, "nx_p": nx_p, "ns_p": ns_p,
        "w_fc": jnp.pad(w_fc, ((0, nx_p - nx), (0, ns_p - n_state))).astype(jnp.bfloat16),
        "b_fc": jnp.pad(b_fc, (0, ns_p - n_state)).reshape(1, ns_p).astype(jnp.float32),
        "w_proj": jnp.pad(w_proj, ((0, ns_p - n_state), (0, nx_p - nx))).astype(jnp.bfloat16),
        "b_proj": jnp.pad(b_proj, (0, nx_p - nx)).reshape(1, nx_p).astype(jnp.float32),
    }


def _mlp_kernel_resident(x_ref, wfc_ref, bfc_ref, wproj_ref, bproj_ref, o_ref):
    # x_ref: (tm, nx_p) bf16 (streamed)   wfc_ref: (nx_p, ns_p) bf16 (resident)
    # bfc_ref: (1, ns_p) f32              wproj_ref: (ns_p, nx_p) bf16 (resident)
    # bproj_ref: (1, nx_p) f32            o_ref: (tm, nx_p)
    h = jnp.dot(x_ref[...], wfc_ref[...], preferred_element_type=jnp.float32)
    h = _gelu_new(h + bfc_ref[...])                      # bias + GELU in f32
    h2 = jnp.dot(h.astype(jnp.bfloat16), wproj_ref[...],
                 preferred_element_type=jnp.float32)
    o_ref[...] = (h2 + bproj_ref[...]).astype(o_ref.dtype)
    # Dropout (resid_pdrop) is identity in eval/inference mode.
    # TODO(synk): pltpu.prng_* dropout path for training mode.


def _mlp_kernel_ns_tiled(x_ref, wfc_ref, bfc_ref, wproj_ref, bproj_ref, o_ref,
                         acc_ref):
    # Grid: (row tiles ["parallel"], n_state tiles ["arbitrary"]).
    # Streams (nx_p, tk) W_fc column blocks and (tk, nx_p) W_proj row blocks;
    # f32 (tm, nx_p) accumulator persists across the n_state axis.
    k = pl.program_id(1)

    @pl.when(k == 0)
    def _():
        acc_ref[...] = jnp.zeros_like(acc_ref)

    h = jnp.dot(x_ref[...], wfc_ref[...], preferred_element_type=jnp.float32)
    h = _gelu_new(h + bfc_ref[...])
    acc_ref[...] += jnp.dot(h.astype(jnp.bfloat16), wproj_ref[...],
                            preferred_element_type=jnp.float32)

    @pl.when(k == pl.num_programs(1) - 1)
    def _():
        o_ref[...] = (acc_ref[...] + bproj_ref[...]).astype(o_ref.dtype)


def _resident_vmem_bytes(tm, nx_p, ns_p, out_itemsize, single_buffer_weights):
    wbuf = 1 if single_buffer_weights else 2
    weights = wbuf * 2 * (nx_p * ns_p * 2)       # two bf16 weight matrices
    biases = wbuf * (ns_p + nx_p) * 4
    x_tiles = 2 * tm * nx_p * 2                  # double-buffered bf16 x
    out_tiles = 2 * tm * nx_p * out_itemsize
    h_tmp = tm * ns_p * (4 + 2)                  # f32 h + bf16 copy
    return weights + biases + x_tiles + out_tiles + h_tmp


def mlp_forward(x, params, *, tm=256, tk=512, out_dtype=None,
                vmem_limit_bytes=None, force_tiled=False):
    """x: (B, T, nx). params: from prepare_mlp_params. Returns (B, T, nx)."""
    B, T, nx_in = x.shape
    nx, n_state = params["nx"], params["n_state"]
    nx_p, ns_p = params["nx_p"], params["ns_p"]
    assert nx_in == nx, "x feature dim does not match prepared params"
    M = B * T
    out_dtype = out_dtype or x.dtype
    if vmem_limit_bytes is None:
        vmem_limit_bytes = _default_vmem_limit_bytes()

    # Row tile: multiple of 16 (bf16 sublane packing); capped so the parallel
    # row axis has >=2 grid steps when M allows (keeps both v7x TCs busy).
    tm_eff = min(tm, _round_up(M, 16))
    if M > 16 and _round_up(M, tm_eff) // tm_eff < 2:
        tm_eff = min(tm_eff, _round_up((M + 1) // 2, 16))
    M_p = _round_up(M, tm_eff)

    # Stream x as bf16 (MXU needs bf16 anyway): half the DMA / VMEM of f32.
    # Zero padding is exact: padded x cols hit zero W_fc rows; padded n_state
    # cols -> gelu(0)=0 and hit zero W_proj rows; padded out rows/cols sliced.
    x2d = jnp.pad(x.reshape(M, nx).astype(jnp.bfloat16),
                  ((0, M_p - M), (0, nx_p - nx)))

    out_itemsize = jnp.dtype(out_dtype).itemsize
    cost = pl.CostEstimate(
        flops=4 * M_p * nx_p * ns_p,                       # two matmuls
        transcendentals=M_p * ns_p,                        # tanh in GELU
        bytes_accessed=(M_p * nx_p * 2                     # bf16 x
                        + M_p * nx_p * out_itemsize        # out
                        + params["w_fc"].size * 2 + params["w_proj"].size * 2
                        + params["b_fc"].size * 4 + params["b_proj"].size * 4),
    )
    args = (x2d, params["w_fc"], params["b_fc"], params["w_proj"], params["b_proj"])

    def call_resident(single_buffer):
        if single_buffer:
            inv = lambda shape: pl.BlockSpec(shape, lambda i: (0, 0),
                                             pipeline_mode=pl.Buffered(1))
        else:
            inv = lambda shape: pl.BlockSpec(shape, lambda i: (0, 0))
        return pl.pallas_call(
            _mlp_kernel_resident,
            out_shape=jax.ShapeDtypeStruct((M_p, nx_p), out_dtype),
            grid_spec=pltpu.PrefetchScalarGridSpec(
                num_scalar_prefetch=0,
                grid=(M_p // tm_eff,),
                in_specs=[
                    pl.BlockSpec((tm_eff, nx_p), lambda i: (i, 0)),  # x rows (streamed)
                    inv((nx_p, ns_p)),                               # W_fc   (resident)
                    inv((1, ns_p)),                                  # b_fc   (resident)
                    inv((ns_p, nx_p)),                               # W_proj (resident)
                    inv((1, nx_p)),                                  # b_proj (resident)
                ],
                out_specs=pl.BlockSpec((tm_eff, nx_p), lambda i: (i, 0)),
            ),
            compiler_params=pltpu.CompilerParams(
                dimension_semantics=("parallel",),
                vmem_limit_bytes=vmem_limit_bytes),
            cost_estimate=cost,
        )(*args)

    def call_tiled(single_buffer):
        tk_eff = min(_round_up(tk, 128), ns_p)
        while ns_p % tk_eff:                    # ns_p is a multiple of 128,
            tk_eff -= 128                       # so this terminates at 128
        grid = (M_p // tm_eff, ns_p // tk_eff)
        if single_buffer:
            bproj_spec = pl.BlockSpec((1, nx_p), lambda i, k: (0, 0),
                                      pipeline_mode=pl.Buffered(1))
        else:
            bproj_spec = pl.BlockSpec((1, nx_p), lambda i, k: (0, 0))
        return pl.pallas_call(
            _mlp_kernel_ns_tiled,
            out_shape=jax.ShapeDtypeStruct((M_p, nx_p), out_dtype),
            grid_spec=pltpu.PrefetchScalarGridSpec(
                num_scalar_prefetch=0,
                grid=grid,
                in_specs=[
                    pl.BlockSpec((tm_eff, nx_p), lambda i, k: (i, 0)),  # x (revisited over k)
                    pl.BlockSpec((nx_p, tk_eff), lambda i, k: (0, k)),  # W_fc col block
                    pl.BlockSpec((1, tk_eff), lambda i, k: (0, k)),     # b_fc slice
                    pl.BlockSpec((tk_eff, nx_p), lambda i, k: (k, 0)),  # W_proj row block
                    bproj_spec,                                         # b_proj
                ],
                out_specs=pl.BlockSpec((tm_eff, nx_p), lambda i, k: (i, 0)),
                scratch_shapes=[pltpu.VMEM((tm_eff, nx_p), jnp.float32)],
            ),
            compiler_params=pltpu.CompilerParams(
                dimension_semantics=("parallel", "arbitrary"),
                vmem_limit_bytes=vmem_limit_bytes),
            cost_estimate=cost,
        )(*args)

    use_tiled = force_tiled or (
        _resident_vmem_bytes(tm_eff, nx_p, ns_p, out_itemsize, True)
        > 0.7 * vmem_limit_bytes)
    call = call_tiled if use_tiled else call_resident

    if _HAS_BUFFERED:
        try:
            out = call(True)
        except Exception:
            # Older jax / lowering rejects pipeline_mode on this path: fall
            # back to default (double-buffered) specs.  Genuine errors will
            # re-raise from the second attempt.
            out = call(False)
    else:
        out = call(False)

    return out[:M, :nx].reshape(B, T, nx)


def _reference(x, w_fc, b_fc, w_proj, b_proj):
    h = _gelu_new(jnp.einsum("btd,dh->bth", x, w_fc) + b_fc)
    return jnp.einsum("bth,hd->btd", h, w_proj) + b_proj


if __name__ == "__main__":
    key = jax.random.PRNGKey(0)
    keys = jax.random.split(key, 10)

    # ---- Test 1: resident-weight path (n_embd=32, n_state=4*n_embd=128) ----
    B, T, nx = 2, 8, 32
    n_state = 4 * nx
    x = jax.random.normal(keys[0], (B, T, nx), dtype=jnp.float32)
    w_fc = 0.02 * jax.random.normal(keys[1], (nx, n_state), dtype=jnp.float32)
    b_fc = 0.01 * jax.random.normal(keys[2], (n_state,), dtype=jnp.float32)
    w_proj = 0.02 * jax.random.normal(keys[3], (n_state, nx), dtype=jnp.float32)
    b_proj = 0.01 * jax.random.normal(keys[4], (nx,), dtype=jnp.float32)

    params = prepare_mlp_params(w_fc, b_fc, w_proj, b_proj)
    out = jax.block_until_ready(mlp_forward(x, params))
    ref = _reference(x, w_fc, b_fc, w_proj, b_proj)
    assert out.shape == (B, T, nx)
    # bf16 activations/weights on the MXU -> relaxed tolerance vs f32 ref.
    assert jnp.allclose(out, ref, atol=1e-2, rtol=1e-2), "resident path mismatch"

    # ---- Test 2: n_state-tiled fallback (ragged M, 2 accumulation steps) ----
    B2, T2, nx2 = 3, 7, 64
    n_state2 = 4 * nx2
    x2 = jax.random.normal(keys[5], (B2, T2, nx2), dtype=jnp.float32)
    w_fc2 = 0.02 * jax.random.normal(keys[6], (nx2, n_state2), dtype=jnp.float32)
    b_fc2 = 0.01 * jax.random.normal(keys[7], (n_state2,), dtype=jnp.float32)
    w_proj2 = 0.02 * jax.random.normal(keys[8], (n_state2, nx2), dtype=jnp.float32)
    b_proj2 = 0.01 * jax.random.normal(keys[9], (nx2,), dtype=jnp.float32)

    params2 = prepare_mlp_params(w_fc2, b_fc2, w_proj2, b_proj2)
    out2 = jax.block_until_ready(
        mlp_forward(x2, params2, tk=128, force_tiled=True))
    ref2 = _reference(x2, w_fc2, b_fc2, w_proj2, b_proj2)
    assert out2.shape == (B2, T2, nx2)
    assert jnp.allclose(out2, ref2, atol=1e-2, rtol=1e-2), "tiled path mismatch"

    print("KERNEL_OK")
</pallas_src>

<mosaic_0001>
module attributes {stable_mosaic.version = 11 : i64} {
  func.func @_mlp_kernel_resident(%arg0: i32, %arg1: memref<16x128xbf16, #tpu.memory_space<vmem>>, %arg2: memref<128x128xbf16, #tpu.memory_space<vmem>>, %arg3: memref<1x128xf32, #tpu.memory_space<vmem>>, %arg4: memref<128x128xbf16, #tpu.memory_space<vmem>>, %arg5: memref<1x128xf32, #tpu.memory_space<vmem>>, %arg6: memref<16x128xf32, #tpu.memory_space<vmem>>) attributes {dimension_semantics = [#tpu.dimension_semantics<parallel>], iteration_bounds = array<i64: 1>, scalar_prefetch = 0 : i64, scratch_operands = 0 : i64, tpu.core_type = #tpu.core_type<tc>, window_params = [{transform_indices = @transform_0, window_bounds = array<i64: 16, 128>}, {pipeline_mode = #tpu.pipeline_mode<synchronous>, transform_indices = @transform_1, window_bounds = array<i64: 128, 128>}, {pipeline_mode = #tpu.pipeline_mode<synchronous>, transform_indices = @transform_2, window_bounds = array<i64: 1, 128>}, {pipeline_mode = #tpu.pipeline_mode<synchronous>, transform_indices = @transform_3, window_bounds = array<i64: 128, 128>}, {pipeline_mode = #tpu.pipeline_mode<synchronous>, transform_indices = @transform_4, window_bounds = array<i64: 1, 128>}, {transform_indices = @transform_5, window_bounds = array<i64: 16, 128>}]} {
    %c0 = arith.constant 0 : index
    %c0_0 = arith.constant 0 : index
    %0 = vector.load %arg1[%c0, %c0_0] : memref<16x128xbf16, #tpu.memory_space<vmem>>, vector<16x128xbf16>
    %c0_1 = arith.constant 0 : index
    %c0_2 = arith.constant 0 : index
    %1 = vector.load %arg2[%c0_1, %c0_2] : memref<128x128xbf16, #tpu.memory_space<vmem>>, vector<128x128xbf16>
    %cst = arith.constant dense<0.000000e+00> : vector<16x128xf32>
    %2 = tpu.matmul %0, %1, %cst {dimension_numbers = #tpu.dot_dimension_numbers<[1], [0], [0], [1], [0, 0, 1, 1], [], []>} : vector<16x128xbf16>, vector<128x128xbf16>, vector<16x128xf32> -> vector<16x128xf32>
    %c0_3 = arith.constant 0 : index
    %c0_4 = arith.constant 0 : index
    %3 = vector.load %arg3[%c0_3, %c0_4] : memref<1x128xf32, #tpu.memory_space<vmem>>, vector<1x128xf32>
    %4 = vector.broadcast %3 : vector<1x128xf32> to vector<16x128xf32>
    %5 = arith.addf %2, %4 : vector<16x128xf32>
    %6 = arith.mulf %5, %5 : vector<16x128xf32>
    %cst_5 = arith.constant 5.000000e-01 : f32
    %7 = vector.broadcast %cst_5 : f32 to vector<16x128xf32>
    %8 = arith.mulf %7, %5 : vector<16x128xf32>
    %cst_6 = arith.constant 0.0356774069 : f32
    %9 = vector.broadcast %cst_6 : f32 to vector<16x128xf32>
    %10 = arith.mulf %9, %6 : vector<16x128xf32>
    %cst_7 = arith.constant 0.797884583 : f32
    %11 = vector.broadcast %cst_7 : f32 to vector<16x128xf32>
    %12 = arith.addf %11, %10 : vector<16x128xf32>
    %13 = arith.mulf %5, %12 : vector<16x128xf32>
    %14 = math.tanh %13 : vector<16x128xf32>
    %cst_8 = arith.constant 1.000000e+00 : f32
    %15 = vector.broadcast %cst_8 : f32 to vector<16x128xf32>
    %16 = arith.addf %15, %14 : vector<16x128xf32>
    %17 = arith.mulf %8, %16 : vector<16x128xf32>
    %18 = arith.truncf %17 : vector<16x128xf32> to vector<16x128xbf16>
    %c0_9 = arith.constant 0 : index
    %c0_10 = arith.constant 0 : index
    %19 = vector.load %arg4[%c0_9, %c0_10] : memref<128x128xbf16, #tpu.memory_space<vmem>>, vector<128x128xbf16>
    %cst_11 = arith.constant dense<0.000000e+00> : vector<16x128xf32>
    %20 = tpu.matmul %18, %19, %cst_11 {dimension_numbers = #tpu.dot_dimension_numbers<[1], [0], [0], [1], [0, 0, 1, 1], [], []>} : vector<16x128xbf16>, vector<128x128xbf16>, vector<16x128xf32> -> vector<16x128xf32>
    %c0_12 = arith.constant 0 : index
    %c0_13 = arith.constant 0 : index
    %21 = vector.load %arg5[%c0_12, %c0_13] : memref<1x128xf32, #tpu.memory_space<vmem>>, vector<1x128xf32>
    %22 = vector.broadcast %21 : vector<1x128xf32> to vector<16x128xf32>
    %23 = arith.addf %20, %22 : vector<16x128xf32>
    %c0_14 = arith.constant 0 : index
    %c0_15 = arith.constant 0 : index
    %24 = vector.load %arg6[%c0_14, %c0_15] : memref<16x128xf32, #tpu.memory_space<vmem>>, vector<16x128xf32>
    tpu.vector_store %arg6[%c0_14, %c0_15], %23 {strides = array<i32>} : memref<16x128xf32, #tpu.memory_space<vmem>>, vector<16x128xf32>,
    return
  }
  func.func @transform_0(%arg0: i32) -> (i32, i32) {
    %c0_i32 = arith.constant 0 : i32
    %c0_i32_0 = arith.constant 0 : i32
    return %arg0, %c0_i32 : i32, i32
  }
  func.func @transform_1(%arg0: i32) -> (i32, i32) {
    %c0_i32 = arith.constant 0 : i32
    %c0_i32_0 = arith.constant 0 : i32
    %c0_i32_1 = arith.constant 0 : i32
    return %c0_i32, %c0_i32_0 : i32, i32
  }
  func.func @transform_2(%arg0: i32) -> (i32, i32) {
    %c0_i32 = arith.constant 0 : i32
    %c0_i32_0 = arith.constant 0 : i32
    %c0_i32_1 = arith.constant 0 : i32
    return %c0_i32, %c0_i32_0 : i32, i32
  }
  func.func @transform_3(%arg0: i32) -> (i32, i32) {
    %c0_i32 = arith.constant 0 : i32
    %c0_i32_0 = arith.constant 0 : i32
    %c0_i32_1 = arith.constant 0 : i32
    return %c0_i32, %c0_i32_0 : i32, i32
  }
  func.func @transform_4(%arg0: i32) -> (i32, i32) {
    %c0_i32 = arith.constant 0 : i32
    %c0_i32_0 = arith.constant 0 : i32
    %c0_i32_1 = arith.constant 0 : i32
    return %c0_i32, %c0_i32_0 : i32, i32
  }
  func.func @transform_5(%arg0: i32) -> (i32, i32) {
    %c0_i32 = arith.constant 0 : i32
    %c0_i32_0 = arith.constant 0 : i32
    return %arg0, %c0_i32 : i32, i32
  }
}

module attributes {stable_mosaic.version = 11 : i64} {
  func.func @_mlp_kernel_resident(%arg0: i32, %arg1: memref<16x128xbf16, #tpu.memory_space<vmem>>, %arg2: memref<128x128xbf16, #tpu.memory_space<vmem>>, %arg3: memref<1x128xf32, #tpu.memory_space<vmem>>, %arg4: memref<128x128xbf16, #tpu.memory_space<vmem>>, %arg5: memref<1x128xf32, #tpu.memory_space<vmem>>, %arg6: memref<16x128xf32, #tpu.memory_space<vmem>>) attributes {dimension_semantics = [#tpu.dimension_semantics<parallel>], iteration_bounds = array<i64: 1>, scalar_prefetch = 0 : i64, scratch_operands = 0 : i64, tpu.core_type = #tpu.core_type<tc>, window_params = [{transform_indices = @transform_0, window_bounds = array<i64: 16, 128>}, {pipeline_mode = #tpu.pipeline_mode<synchronous>, transform_indices = @transform_1, window_bounds = array<i64: 128, 128>}, {pipeline_mode = #tpu.pipeline_mode<synchronous>, transform_indices = @transform_2, window_bounds = array<i64: 1, 128>}, {pipeline_mode = #tpu.pipeline_mode<synchronous>, transform_indices = @transform_3, window_bounds = array<i64: 128, 128>}, {pipeline_mode = #tpu.pipeline_mode<synchronous>, transform_indices = @transform_4, window_bounds = array<i64: 1, 128>}, {transform_indices = @transform_5, window_bounds = array<i64: 16, 128>}]} {
    %c0 = arith.constant 0 : index
    %c0_0 = arith.constant 0 : index
    %0 = vector.load %arg1[%c0, %c0_0] : memref<16x128xbf16, #tpu.memory_space<vmem>>, vector<16x128xbf16>
    %c0_1 = arith.constant 0 : index
    %c0_2 = arith.constant 0 : index
    %1 = vector.load %arg2[%c0_1, %c0_2] : memref<128x128xbf16, #tpu.memory_space<vmem>>, vector<128x128xbf16>
    %cst = arith.constant dense<0.000000e+00> : vector<16x128xf32>
    %2 = tpu.matmul %0, %1, %cst {dimension_numbers = #tpu.dot_dimension_numbers<[1], [0], [0], [1], [0, 0, 1, 1], [], []>} : vector<16x128xbf16>, vector<128x128xbf16>, vector<16x128xf32> -> vector<16x128xf32>
    %c0_3 = arith.constant 0 : index
    %c0_4 = arith.constant 0 : index
    %3 = vector.load %arg3[%c0_3, %c0_4] : memref<1x128xf32, #tpu.memory_space<vmem>>, vector<1x128xf32>
    %4 = vector.broadcast %3 : vector<1x128xf32> to vector<16x128xf32>
    %5 = arith.addf %2, %4 : vector<16x128xf32>
    %6 = arith.mulf %5, %5 : vector<16x128xf32>
    %cst_5 = arith.constant 5.000000e-01 : f32
    %7 = vector.broadcast %cst_5 : f32 to vector<16x128xf32>
    %8 = arith.mulf %7, %5 : vector<16x128xf32>
    %cst_6 = arith.constant 0.0356774069 : f32
    %9 = vector.broadcast %cst_6 : f32 to vector<16x128xf32>
    %10 = arith.mulf %9, %6 : vector<16x128xf32>
    %cst_7 = arith.constant 0.797884583 : f32
    %11 = vector.broadcast %cst_7 : f32 to vector<16x128xf32>
    %12 = arith.addf %11, %10 : vector<16x128xf32>
    %13 = arith.mulf %5, %12 : vector<16x128xf32>
    %14 = math.tanh %13 : vector<16x128xf32>
    %cst_8 = arith.constant 1.000000e+00 : f32
    %15 = vector.broadcast %cst_8 : f32 to vector<16x128xf32>
    %16 = arith.addf %15, %14 : vector<16x128xf32>
    %17 = arith.mulf %8, %16 : vector<16x128xf32>
    %18 = arith.truncf %17 : vector<16x128xf32> to vector<16x128xbf16>
    %c0_9 = arith.constant 0 : index
    %c0_10 = arith.constant 0 : index
    %19 = vector.load %arg4[%c0_9, %c0_10] : memref<128x128xbf16, #tpu.memory_space<vmem>>, vector<128x128xbf16>
    %cst_11 = arith.constant dense<0.000000e+00> : vector<16x128xf32>
    %20 = tpu.matmul %18, %19, %cst_11 {dimension_numbers = #tpu.dot_dimension_numbers<[1], [0], [0], [1], [0, 0, 1, 1], [], []>} : vector<16x128xbf16>, vector<128x128xbf16>, vector<16x128xf32> -> vector<16x128xf32>
    %c0_12 = arith.constant 0 : index
    %c0_13 = arith.constant 0 : index
    %21 = vector.load %arg5[%c0_12, %c0_13] : memref<1x128xf32, #tpu.memory_space<vmem>>, vector<1x128xf32>
    %22 = vector.broadcast %21 : vector<1x128xf32> to vector<16x128xf32>
    %23 = arith.addf %20, %22 : vector<16x128xf32>
    %c0_14 = arith.constant 0 : index
    %c0_15 = arith.constant 0 : index
    %24 = vector.load %arg6[%c0_14, %c0_15] : memref<16x128xf32, #tpu.memory_space<vmem>>, vector<16x128xf32>
    tpu.vector_store %arg6[%c0_14, %c0_15], %23 {strides = array<i32>} : memref<16x128xf32, #tpu.memory_space<vmem>>, vector<16x128xf32>,
    return
  }
  func.func @transform_0(%arg0: i32) -> (i32, i32) {
    %c0_i32 = arith.constant 0 : i32
    %c0_i32_0 = arith.constant 0 : i32
    return %arg0, %c0_i32 : i32, i32
  }
  func.func @transform_1(%arg0: i32) -> (i32, i32) {
    %c0_i32 = arith.constant 0 : i32
    %c0_i32_0 = arith.constant 0 : i32
    %c0_i32_1 = arith.constant 0 : i32
    return %c0_i32, %c0_i32_0 : i32, i32
  }
  func.func @transform_2(%arg0: i32) -> (i32, i32) {
    %c0_i32 = arith.constant 0 : i32
    %c0_i32_0 = arith.constant 0 : i32
    %c0_i32_1 = arith.constant 0 : i32
    return %c0_i32, %c0_i32_0 : i32, i32
  }
  func.func @transform_3(%arg0: i32) -> (i32, i32) {
    %c0_i32 = arith.constant 0 : i32
    %c0_i32_0 = arith.constant 0 : i32
    %c0_i32_1 = arith.constant 0 : i32
    return %c0_i32, %c0_i32_0 : i32, i32
  }
  func.func @transform_4(%arg0: i32) -> (i32, i32) {
    %c0_i32 = arith.constant 0 : i32
    %c0_i32_0 = arith.constant 0 : i32
    %c0_i32_1 = arith.constant 0 : i32
    return %c0_i32, %c0_i32_0 : i32, i32
  }
  func.func @transform_5(%arg0: i32) -> (i32, i32) {
    %c0_i32 = arith.constant 0 : i32
    %c0_i32_0 = arith.constant 0 : i32
    return %arg0, %c0_i32 : i32, i32
  }
}

</mosaic_0001>

<bundles_post_ra>
// kernel: tpu_custom_call.1
= control target key start
LH: loop header
LB: loop body
LE: loop exit
PB: predicated region body
PF: predicated region fallthrough
CT: control target
= control target key end

     0   :  { %10 = vsyncpa [#allocation3], 0  ;;  %s536_s0 = inlined_call_operand.hbm [shape: bf16[16,128], index: 0, kind: input, shape index: {}]   ;;  %s537_s1 = inlined_call_operand.hbm [shape: bf16[128,128], index: 1, kind: input, shape index: {}]   ;;  %s538_s2 = inlined_call_operand.vmem [shape: f32[1,128], index: 2, kind: input, shape index: {}]   ;;  %s539_s3 = inlined_call_operand.hbm [shape: bf16[128,128], index: 3, kind: input, shape index: {}]   ;;  %s540_s4 = inlined_call_operand.vmem [shape: f32[1,128], index: 4, kind: input, shape index: {}]   ;;  %s541_s5 = inlined_call_operand.hbm [shape: f32[16,128], index: 5, kind: output, shape index: {}]  }
   0x1   :  { %11 = vsyncpa [#allocation6], 0 }
   0x2   :  { %12 = vsyncpa [#allocation4], 0  ;;  %s30_s20 = sshll.u32 %s537_s1, 4  ;;  %s480_s21 = smov [#allocation5]   ;;  %s31_s20 = int_to_ptr.hbm [resolvable:$true] %s30_s20 }
   0x3   :  { %s32_s22 = sshll.u32 %s480_s21, 4  ;;  %s17_s25 = sshll.u32 %s536_s0, 4  ;;  %s33_s22 = int_to_ptr.vmem [resolvable:$true] %s32_s22  ;;  %s18_s25 = int_to_ptr.hbm [resolvable:$true] %s17_s25 }
   0x4   :  { %s481_s26 = smov 64   ;;  %s482_s27 = smov 4  }
   0x5   :  { %38 = dma.hbm_to_vmem [thread:$0]  %s31_s20, 1024, %s33_s22, [#allocation6], %s481_s26, %s481_s26, %s482_s27  }
   0x6   :  { %s483_s28 = smov [#allocation2]   ;;  %s45_s7 = sshll.u32 %s539_s3, 4  ;;  %s46_s7 = int_to_ptr.hbm [resolvable:$true] %s45_s7 }
   0x7   :  { %s19_s29 = sshll.u32 %s483_s28, 4  ;;  %s484_s1 = smov [#allocation7]   ;;  %s20_s29 = int_to_ptr.vmem [resolvable:$true] %s19_s29 }
   0x8   :  { %25 = dma.hbm_to_vmem [thread:$0]  %s18_s25, 128, %s20_s29, [#allocation3], %s481_s26, %s481_s26, %s482_s27  }
   0x9   :  { %s47_s8 = sshll.u32 %s484_s1, 4  ;;  %s48_s8 = int_to_ptr.vmem [resolvable:$true] %s47_s8 }
   0xa   :  { %53 = dma.hbm_to_vmem [thread:$0]  %s46_s7, 1024, %s48_s8, [#allocation6], %s481_s26, %s481_s26, %s482_s27  }
   0xb   :  { %474 = dma.done.wait [#allocation3], 128  }
   0xc   :  { %475 = vsyncadd [#allocation3], 4294967168 }
   0xd   :  { %476 = dma.done.wait [#allocation6], 2048  }
   0xe   :  { %477 = vsyncadd [#allocation6], 4294965248  ;;  %v355_v0 = vld [vmem:[#allocation5 + $0x38] sm:$0xff]  ;;  %v354_v1 = vld [vmem:[#allocation5 + $0x30] sm:$0xff]  ;;  %s485_s10 = smov [#allocation8]   ;;  %s265_s14 = sshll.u32 %s541_s5, 4  ;;  %s266_s14 = int_to_ptr.hbm [resolvable:$true] %s265_s14 }
   0xf   :  { %144 = vmatpush.bf16.msra.mxu0 %v355_v0  ;;  %v353_v2 = vld [vmem:[#allocation5 + $0x28] sm:$0xff]  ;;  %v352_v3 = vld [vmem:[#allocation5 + $0x20] sm:$0xff]  ;;  %v351_v4 = vld [vmem:[#allocation5 + $0x18] sm:$0xff]  ;;  %s263_s11 = sshll.u32 %s485_s10, 4  ;;  %s486_s15 = smov 128   ;;  %s264_s11 = int_to_ptr.vmem [resolvable:$true] %s263_s11 }
  0x10   :  { %v350_v5 = vld [vmem:[#allocation5 + $0x10] sm:$0xff]  ;;  %v349_v6 = vld [vmem:[#allocation5 + $0x8] sm:$0xff]  ;;  %v348_v7 = vld [vmem:[#allocation5] sm:$0xff]  ;;  %s487_s16 = smov 8  }
  0x11   :  { %v347_v8 = vld [vmem:[#allocation2] sm:$0xff]  ;;  %v362_v10 = vld [vmem:[#allocation7 + $0x30] sm:$0xff]  ;;  %v361_v11 = vld [vmem:[#allocation7 + $0x28] sm:$0xff] }
  0x12   :  { %v363_v9 = vld [vmem:[#allocation7 + $0x38] sm:$0xff]  ;;  %v360_v12 = vld [vmem:[#allocation7 + $0x20] sm:$0xff]  ;;  %v358_v14 = vld [vmem:[#allocation7 + $0x10] sm:$0xff] }
  0x13   :  { %145 = vmatpush.bf16.msra.mxu0 %v354_v1  ;;  %243 = vmatpush.bf16.msra.mxu1 %v363_v9  ;;  %v359_v13 = vld [vmem:[#allocation7 + $0x18] sm:$0xff]  ;;  %v357_v15 = vld [vmem:[#allocation7 + $0x8] sm:$0xff]  ;;  %v356_v16 = vld [vmem:[#allocation7] sm:$0xff] }
  0x14   :  { %v372_v17 = vld [vmem:[%s538_s2] ss:$0 sm:$0xff] }
  0x15   :  { %v373_v39 = vld [vmem:[%s540_s4] ss:$0 sm:$0xff] }
  0x17   :  { %146 = vmatpush.bf16.msra.mxu0 %v353_v2  ;;  %244 = vmatpush.bf16.msra.mxu1 %v362_v10 }
  0x1b   :  { %147 = vmatpush.bf16.msra.mxu0 %v352_v3  ;;  %245 = vmatpush.bf16.msra.mxu1 %v361_v11 }
  0x1f   :  { %148 = vmatpush.bf16.msra.mxu0 %v351_v4  ;;  %246 = vmatpush.bf16.msra.mxu1 %v360_v12 }
  0x23   :  { %149 = vmatpush.bf16.msra.mxu0 %v350_v5  ;;  %247 = vmatpush.bf16.msra.mxu1 %v359_v13 }
  0x27   :  { %150 = vmatpush.bf16.msra.mxu0 %v349_v6  ;;  %248 = vmatpush.bf16.msra.mxu1 %v358_v14 }
  0x2b   :  { %151 = vmatpush.bf16.msra.mxu0 %v348_v7  ;;  %249 = vmatpush.bf16.msra.mxu1 %v357_v15 }
  0x2e   :  { %152 = vmatmul.bf16.vlgmr.msra.gmra.mxu0 %v347_v8 }
  0x2f   :  { %250 = vmatpush.bf16.msra.mxu1 %v356_v16 }
  0xab   :  { %v153_v18 = vpop.f32.mrf.mxu0 }
  0xac   :  { %v154_v19 = vadd.f32 %v372_v17, %v153_v18 }
  0xae   :  { %v158_v20 = vmul.f32 %v154_v19, %v154_v19  ;;  %v160_v33 = vmul.f32 0.5, %v154_v19 }
  0xb0   :  { %v162_v21 = vmul.f32 0.035677407, %v158_v20 }
  0xb2   :  { %v164_v22 = vadd.f32 0.7978846, %v162_v21 }
  0xb3   :  { %v155_v23 = vpop.f32.mrf.mxu0 }
  0xb4   :  { %v156_v24 = vadd.f32 %v372_v17, %v155_v23  ;;  %v166_v25 = vmul.f32 %v164_v22, %v154_v19 }
  0xb6   :  { %v159_v26 = vmul.f32 %v156_v24, %v156_v24  ;;  %374 = vtanh.f32 %v166_v25  ;;  %v161_v34 = vmul.f32 0.5, %v156_v24 }
  0xb8   :  { %v163_v27 = vmul.f32 0.035677407, %v159_v26 }
  0xba   :  { %v165_v28 = vadd.f32 0.7978846, %v163_v27 }
  0xbc   :  { %v167_v29 = vmul.f32 %v165_v28, %v156_v24  ;;  %v375_v30 = vpop.eup %374 }
  0xbd   :  { %v170_v31 = vadd.f32 1.0, %v375_v30 }
  0xbe   :  { %376 = vtanh.f32 %v167_v29 }
  0xbf   :  { %v172_v36 = vmul.f32 %v170_v31, %v160_v33 }
  0xc4   :  { %v377_v32 = vpop.eup %376 }
  0xc5   :  { %v171_v35 = vadd.f32 1.0, %v377_v32 }
  0xc7   :  { %v173_v37 = vmul.f32 %v171_v35, %v161_v34 }
  0xc9   :  { %v174_v38 = vpack.c.bf16 %v173_v37, %v172_v36 }
  0xcb   :  { %251 = vmatmul.bf16.vlgmr.msra.gmra.mxu1 %v174_v38 }
 0x148   :  { %v252_v40 = vpop.f32.mrf.mxu1 }
 0x149   :  { %v253_v41 = vadd.f32 %v373_v39, %v252_v40 }
 0x14b   :  { %257 = vst [vmem:[#allocation8] sm:$0xff] %v253_v41 }
 0x150   :  { %v254_v42 = vpop.f32.mrf.mxu1 }
 0x151   :  { %v255_v43 = vadd.f32 %v373_v39, %v254_v42 }
 0x153   :  { %258 = vst [vmem:[#allocation8 + $0x8] sm:$0xff] %v255_v43 }
 0x154   :  { %271 = dma.vmem_to_hbm [thread:$0]  %s264_s11, 256, %s266_s14, [#allocation4], %s486_s15, %s486_s15, %s487_s16  }
 0x155   :  { %478 = dma.done.wait [#allocation4], 256  }
 0x156   :  { %479 = vsyncadd [#allocation4], 4294967040 }
 0x157   :  { %276 = vsyncpa [#allocation3], 1 }
 0x158   :  { %277 = vsyncpa [#allocation6], 1 }
 0x159   :  { %278 = vsyncpa [#allocation4], 1 }

// kernel: tpu_custom_call.1
= control target key start
LH: loop header
LB: loop body
LE: loop exit
PB: predicated region body
PF: predicated region fallthrough
CT: control target
= control target key end

     0   :  { %10 = vsyncpa [#allocation3], 0  ;;  %s536_s0 = inlined_call_operand.hbm [shape: bf16[16,128], index: 0, kind: input, shape index: {}]   ;;  %s537_s1 = inlined_call_operand.hbm [shape: bf16[128,128], index: 1, kind: input, shape index: {}]   ;;  %s538_s2 = inlined_call_operand.vmem [shape: f32[1,128], index: 2, kind: input, shape index: {}]   ;;  %s539_s3 = inlined_call_operand.hbm [shape: bf16[128,128], index: 3, kind: input, shape index: {}]   ;;  %s540_s4 = inlined_call_operand.vmem [shape: f32[1,128], index: 4, kind: input, shape index: {}]   ;;  %s541_s5 = inlined_call_operand.hbm [shape: f32[16,128], index: 5, kind: output, shape index: {}]  }
   0x1   :  { %11 = vsyncpa [#allocation6], 0 }
   0x2   :  { %12 = vsyncpa [#allocation4], 0  ;;  %s30_s20 = sshll.u32 %s537_s1, 4  ;;  %s480_s21 = smov [#allocation5]   ;;  %s31_s20 = int_to_ptr.hbm [resolvable:$true] %s30_s20 }
   0x3   :  { %s32_s22 = sshll.u32 %s480_s21, 4  ;;  %s17_s25 = sshll.u32 %s536_s0, 4  ;;  %s33_s22 = int_to_ptr.vmem [resolvable:$true] %s32_s22  ;;  %s18_s25 = int_to_ptr.hbm [resolvable:$true] %s17_s25 }
   0x4   :  { %s481_s26 = smov 64   ;;  %s482_s27 = smov 4  }
   0x5   :  { %38 = dma.hbm_to_vmem [thread:$0]  %s31_s20, 1024, %s33_s22, [#allocation6], %s481_s26, %s481_s26, %s482_s27  }
   0x6   :  { %s483_s28 = smov [#allocation2]   ;;  %s45_s7 = sshll.u32 %s539_s3, 4  ;;  %s46_s7 = int_to_ptr.hbm [resolvable:$true] %s45_s7 }
   0x7   :  { %s19_s29 = sshll.u32 %s483_s28, 4  ;;  %s484_s1 = smov [#allocation7]   ;;  %s20_s29 = int_to_ptr.vmem [resolvable:$true] %s19_s29 }
   0x8   :  { %25 = dma.hbm_to_vmem [thread:$0]  %s18_s25, 128, %s20_s29, [#allocation3], %s481_s26, %s481_s26, %s482_s27  }
   0x9   :  { %s47_s8 = sshll.u32 %s484_s1, 4  ;;  %s48_s8 = int_to_ptr.vmem [resolvable:$true] %s47_s8 }
   0xa   :  { %53 = dma.hbm_to_vmem [thread:$0]  %s46_s7, 1024, %s48_s8, [#allocation6], %s481_s26, %s481_s26, %s482_s27  }
   0xb   :  { %474 = dma.done.wait [#allocation3], 128  }
   0xc   :  { %475 = vsyncadd [#allocation3], 4294967168 }
   0xd   :  { %476 = dma.done.wait [#allocation6], 2048  }
   0xe   :  { %477 = vsyncadd [#allocation6], 4294965248  ;;  %v355_v0 = vld [vmem:[#allocation5 + $0x38] sm:$0xff]  ;;  %v354_v1 = vld [vmem:[#allocation5 + $0x30] sm:$0xff]  ;;  %s485_s10 = smov [#allocation8]   ;;  %s265_s14 = sshll.u32 %s541_s5, 4  ;;  %s266_s14 = int_to_ptr.hbm [resolvable:$true] %s265_s14 }
   0xf   :  { %144 = vmatpush.bf16.msra.mxu0 %v355_v0  ;;  %v353_v2 = vld [vmem:[#allocation5 + $0x28] sm:$0xff]  ;;  %v352_v3 = vld [vmem:[#allocation5 + $0x20] sm:$0xff]  ;;  %v351_v4 = vld [vmem:[#allocation5 + $0x18] sm:$0xff]  ;;  %s263_s11 = sshll.u32 %s485_s10, 4  ;;  %s486_s15 = smov 128   ;;  %s264_s11 = int_to_ptr.vmem [resolvable:$true] %s263_s11 }
  0x10   :  { %v350_v5 = vld [vmem:[#allocation5 + $0x10] sm:$0xff]  ;;  %v349_v6 = vld [vmem:[#allocation5 + $0x8] sm:$0xff]  ;;  %v348_v7 = vld [vmem:[#allocation5] sm:$0xff]  ;;  %s487_s16 = smov 8  }
  0x11   :  { %v347_v8 = vld [vmem:[#allocation2] sm:$0xff]  ;;  %v362_v10 = vld [vmem:[#allocation7 + $0x30] sm:$0xff]  ;;  %v361_v11 = vld [vmem:[#allocation7 + $0x28] sm:$0xff] }
  0x12   :  { %v363_v9 = vld [vmem:[#allocation7 + $0x38] sm:$0xff]  ;;  %v360_v12 = vld [vmem:[#allocation7 + $0x20] sm:$0xff]  ;;  %v358_v14 = vld [vmem:[#allocation7 + $0x10] sm:$0xff] }
  0x13   :  { %145 = vmatpush.bf16.msra.mxu0 %v354_v1  ;;  %243 = vmatpush.bf16.msra.mxu1 %v363_v9  ;;  %v359_v13 = vld [vmem:[#allocation7 + $0x18] sm:$0xff]  ;;  %v357_v15 = vld [vmem:[#allocation7 + $0x8] sm:$0xff]  ;;  %v356_v16 = vld [vmem:[#allocation7] sm:$0xff] }
  0x14   :  { %v372_v17 = vld [vmem:[%s538_s2] ss:$0 sm:$0xff] }
  0x15   :  { %v373_v39 = vld [vmem:[%s540_s4] ss:$0 sm:$0xff] }
  0x17   :  { %146 = vmatpush.bf16.msra.mxu0 %v353_v2  ;;  %244 = vmatpush.bf16.msra.mxu1 %v362_v10 }
  0x1b   :  { %147 = vmatpush.bf16.msra.mxu0 %v352_v3  ;;  %245 = vmatpush.bf16.msra.mxu1 %v361_v11 }
  0x1f   :  { %148 = vmatpush.bf16.msra.mxu0 %v351_v4  ;;  %246 = vmatpush.bf16.msra.mxu1 %v360_v12 }
  0x23   :  { %149 = vmatpush.bf16.msra.mxu0 %v350_v5  ;;  %247 = vmatpush.bf16.msra.mxu1 %v359_v13 }
  0x27   :  { %150 = vmatpush.bf16.msra.mxu0 %v349_v6  ;;  %248 = vmatpush.bf16.msra.mxu1 %v358_v14 }
  0x2b   :  { %151 = vmatpush.bf16.msra.mxu0 %v348_v7  ;;  %249 = vmatpush.bf16.msra.mxu1 %v357_v15 }
  0x2e   :  { %152 = vmatmul.bf16.vlgmr.msra.gmra.mxu0 %v347_v8 }
  0x2f   :  { %250 = vmatpush.bf16.msra.mxu1 %v356_v16 }
  0xab   :  { %v153_v18 = vpop.f32.mrf.mxu0 }
  0xac   :  { %v154_v19 = vadd.f32 %v372_v17, %v153_v18 }
  0xae   :  { %v158_v20 = vmul.f32 %v154_v19, %v154_v19  ;;  %v160_v33 = vmul.f32 0.5, %v154_v19 }
  0xb0   :  { %v162_v21 = vmul.f32 0.035677407, %v158_v20 }
  0xb2   :  { %v164_v22 = vadd.f32 0.7978846, %v162_v21 }
  0xb3   :  { %v155_v23 = vpop.f32.mrf.mxu0 }
  0xb4   :  { %v156_v24 = vadd.f32 %v372_v17, %v155_v23  ;;  %v166_v25 = vmul.f32 %v164_v22, %v154_v19 }
  0xb6   :  { %v159_v26 = vmul.f32 %v156_v24, %v156_v24  ;;  %374 = vtanh.f32 %v166_v25  ;;  %v161_v34 = vmul.f32 0.5, %v156_v24 }
  0xb8   :  { %v163_v27 = vmul.f32 0.035677407, %v159_v26 }
  0xba   :  { %v165_v28 = vadd.f32 0.7978846, %v163_v27 }
  0xbc   :  { %v167_v29 = vmul.f32 %v165_v28, %v156_v24  ;;  %v375_v30 = vpop.eup %374 }
  0xbd   :  { %v170_v31 = vadd.f32 1.0, %v375_v30 }
  0xbe   :  { %376 = vtanh.f32 %v167_v29 }
  0xbf   :  { %v172_v36 = vmul.f32 %v170_v31, %v160_v33 }
  0xc4   :  { %v377_v32 = vpop.eup %376 }
  0xc5   :  { %v171_v35 = vadd.f32 1.0, %v377_v32 }
  0xc7   :  { %v173_v37 = vmul.f32 %v171_v35, %v161_v34 }
  0xc9   :  { %v174_v38 = vpack.c.bf16 %v173_v37, %v172_v36 }
  0xcb   :  { %251 = vmatmul.bf16.vlgmr.msra.gmra.mxu1 %v174_v38 }
 0x148   :  { %v252_v40 = vpop.f32.mrf.mxu1 }
 0x149   :  { %v253_v41 = vadd.f32 %v373_v39, %v252_v40 }
 0x14b   :  { %257 = vst [vmem:[#allocation8] sm:$0xff] %v253_v41 }
 0x150   :  { %v254_v42 = vpop.f32.mrf.mxu1 }
 0x151   :  { %v255_v43 = vadd.f32 %v373_v39, %v254_v42 }
 0x153   :  { %258 = vst [vmem:[#allocation8 + $0x8] sm:$0xff] %v255_v43 }
 0x154   :  { %271 = dma.vmem_to_hbm [thread:$0]  %s264_s11, 256, %s266_s14, [#allocation4], %s486_s15, %s486_s15, %s487_s16  }
 0x155   :  { %478 = dma.done.wait [#allocation4], 256  }
 0x156   :  { %479 = vsyncadd [#allocation4], 4294967040 }
 0x157   :  { %276 = vsyncpa [#allocation3], 1 }
 0x158   :  { %277 = vsyncpa [#allocation6], 1 }
 0x159   :  { %278 = vsyncpa [#allocation4], 1 }

</bundles_post_ra>
